<compile_context>
chip_gen: v5e
topology: v5e:2x2
jax: 0.10.0
libtpu: 0.0.40
codegen_flags: <defaults>
</compile_context>

<pallas_src>
import functools

import jax
import jax.numpy as jnp
from jax.experimental import pallas as pl
from jax.experimental.pallas import tpu as pltpu


def _round_up(x, m):
    return ((x + m - 1) // m) * m


def _cdiv(a, b):
    return (a + b - 1) // b


def _choose_tile_rows(R, HW, itemsize):
    """Pick the row-tile size for the (R, HW) view.

    - 2-4 MiB blocks: big enough to amortize the ~0.35 us per-grid-step overhead
      (<2% of the per-block DMA on every generation), small enough that the
      double-buffered input stays well under v7x's 32 MiB scoped VMEM.
    - Rows rounded to the dtype's sublane packing (8 f32 / 16 bf16 / 32 int8).
    - Aim for an even block count >= 4 when R allows, so the "parallel" grid axis
      balances across v7x's two TensorCores.
    """
    sub = max(8, 32 // max(1, itemsize))
    bytes_per_row = max(1, HW * itemsize)
    max_block_bytes = 4 << 20
    rows_vmem = max(sub, ((max_block_bytes // bytes_per_row) // sub) * sub)
    min_blocks = _cdiv(R, rows_vmem)
    target_blocks = max(4, min_blocks + (min_blocks % 2))   # even, >= 4
    tile = max(sub, _round_up(_cdiv(R, target_blocks), sub))
    return min(tile, rows_vmem)


def _int_power(x, n: int):
    """x**n for a static positive integer n using only VPU multiplies."""
    assert n >= 1
    result = None
    base = x
    while True:
        if n & 1:
            result = base if result is None else result * base
        n >>= 1
        if n == 0:
            break
        base = base * base
    return result


def _static_pow(x, p: float):
    """x**p for a static positive integer or half-integer p (no per-elt log/exp)."""
    k = int(p)
    frac = p - k
    out = _int_power(x, k) if k >= 1 else None
    if frac != 0.0:
        s = jnp.sqrt(x)                  # single EUP op per element
        out = s if out is None else out * s
    return out


_F32_TINY = float(jnp.finfo(jnp.float32).tiny)


def _gem_kernel_staticp(x_ref, o_ref, *, eps, p):
    # Fast path: p known at trace time (integer or half-integer).
    # x_ref: VMEM (tile_rows, HW) in native dtype; o_ref: VMEM (tile_rows, 1) f32.
    x = x_ref[...].astype(jnp.float32)
    xc = jnp.maximum(x, jnp.float32(eps))                 # clamp(min=eps), eps > 0
    powed = _static_pow(xc, p)                            # VPU (+1 EUP sqrt if half-int)
    mean = jnp.mean(powed, axis=-1, keepdims=True)        # avg over full spatial extent
    mean = jnp.maximum(mean, jnp.float32(_F32_TINY))      # full-underflow guard
    # Per-row epilogue: only tile_rows elements see exp/log (hidden under block DMA).
    o_ref[...] = jnp.exp(jnp.log(mean) * jnp.float32(1.0 / p)).astype(o_ref.dtype)


def _gem_kernel_generic(p_ref, x_ref, o_ref, *, eps):
    # Generic path: learnable / runtime p read from SMEM.  Direct exp(p*log(xc))
    # matches the reference's per-element pow (including its overflow behaviour)
    # with 2 EUP ops per element and no per-row max pass.
    p = p_ref[0]
    inv_p = 1.0 / p                                       # one scalar divide per step
    x = x_ref[...].astype(jnp.float32)
    xc = jnp.maximum(x, jnp.float32(eps))                 # xc >= eps > 0
    powed = jnp.exp(p * jnp.log(xc))                      # xc ** p
    mean = jnp.mean(powed, axis=-1, keepdims=True)
    mean = jnp.maximum(mean, jnp.float32(_F32_TINY))      # full-underflow guard
    o_ref[...] = jnp.exp(jnp.log(mean) * inv_p).astype(o_ref.dtype)


def gem_pallas(x, p, eps=1e-6, *, static_p=None):
    """GeM forward. x: (N, C, H, W), p: (1,) f32 -> (N, C, 1, 1) in x.dtype.

    If `static_p` is a positive integer or half-integer (GeM default p=3), a
    transcendental-light kernel is used and the runtime `p` array is assumed
    equal to it.  Otherwise the generic kernel reads p from SMEM at runtime.
    """
    N, C, H, W = x.shape
    R, HW = N * C, H * W
    x2 = x.reshape(R, HW)                     # free metadata reshape, native dtype

    itemsize = jnp.dtype(x.dtype).itemsize
    tile_rows = _choose_tile_rows(R, HW, itemsize)
    num_blocks = _cdiv(R, tile_rows)          # partial last block handled by Pallas

    x_spec = pl.BlockSpec((tile_rows, HW), lambda i: (i, 0))
    o_spec = pl.BlockSpec((tile_rows, 1), lambda i: (i, 0))
    out_shape = jax.ShapeDtypeStruct((R, 1), jnp.float32)
    cparams = pltpu.CompilerParams(
        dimension_semantics=("parallel",),    # shard row-blocks across TCs on v7x
        vmem_limit_bytes=40 << 20,            # > v5e's 16 MiB scoped default, safe on v7x
    )

    use_static = False
    if static_p is not None:
        sp = float(static_p)
        if sp > 0.0 and (2.0 * sp) == float(int(2.0 * sp)):
            use_static = True

    if use_static:
        kernel = functools.partial(_gem_kernel_staticp, eps=float(eps), p=sp)
        out = pl.pallas_call(
            kernel,
            out_shape=out_shape,
            grid_spec=pltpu.PrefetchScalarGridSpec(
                num_scalar_prefetch=0,
                grid=(num_blocks,),
                in_specs=[x_spec],
                out_specs=o_spec,
            ),
            compiler_params=cparams,
        )(x2)
    else:
        p_arr = jnp.asarray(p, dtype=jnp.float32).reshape((1,))
        kernel = functools.partial(_gem_kernel_generic, eps=float(eps))
        out = pl.pallas_call(
            kernel,
            out_shape=out_shape,
            grid_spec=pltpu.PrefetchScalarGridSpec(
                num_scalar_prefetch=0,
                grid=(num_blocks,),
                in_specs=[
                    pl.BlockSpec(memory_space=pltpu.SMEM),   # p (scalar parameter)
                    x_spec,
                ],
                out_specs=o_spec,
            ),
            compiler_params=cparams,
        )(p_arr, x2)

    return out.reshape(N, C, 1, 1).astype(x.dtype)


def gem_ref(x, p, eps=1e-6):
    """Pure-JAX reference mirroring F.avg_pool2d(clamp(x).pow(p), (H,W)).pow(1/p)."""
    xc = jnp.maximum(x.astype(jnp.float32), eps)
    powed = xc ** p[0]
    mean = jnp.mean(powed, axis=(-2, -1), keepdims=True)
    return mean ** (1.0 / p[0])


if __name__ == "__main__":
    key = jax.random.PRNGKey(0)
    eps = 1e-6

    # Module-consistent small shape: batch=2, channels=4, spatial=16.
    N, C, H, W = 2, 4, 16, 16
    x = jax.random.normal(key, (N, C, H, W), dtype=jnp.float32)
    # nn.Parameter(torch.ones(1) * 3) -> deterministic init p = 3.0.
    p_param = jnp.ones((1,), dtype=jnp.float32) * 3.0

    ref = gem_ref(x, p_param, eps=eps)

    # 1) Static integer-p fast path (GeM default p=3): VPU-only powers.
    out_fast = gem_pallas(x, p_param, eps=eps, static_p=3)
    jax.block_until_ready(out_fast)
    assert out_fast.shape == (N, C, 1, 1)
    assert jnp.allclose(out_fast.astype(jnp.float32), ref, rtol=1e-4, atol=1e-5), (
        f"int-p mismatch: max abs err {jnp.max(jnp.abs(out_fast.astype(jnp.float32) - ref))}")

    # 2) Generic runtime-p path (p read from SMEM).
    out_gen = gem_pallas(x, p_param, eps=eps)
    jax.block_until_ready(out_gen)
    assert out_gen.shape == (N, C, 1, 1)
    assert jnp.allclose(out_gen.astype(jnp.float32), ref, rtol=1e-4, atol=1e-5), (
        f"generic mismatch: max abs err {jnp.max(jnp.abs(out_gen.astype(jnp.float32) - ref))}")

    # 3) Static half-integer p (int-power * sqrt, no per-element log/exp).
    p_half = jnp.ones((1,), dtype=jnp.float32) * 2.5
    out_half = gem_pallas(x, p_half, eps=eps, static_p=2.5)
    jax.block_until_ready(out_half)
    ref_half = gem_ref(x, p_half, eps=eps)
    assert jnp.allclose(out_half.astype(jnp.float32), ref_half, rtol=1e-4, atol=1e-5), (
        f"half-p mismatch: max abs err {jnp.max(jnp.abs(out_half.astype(jnp.float32) - ref_half))}")

    # 4) Ragged row count -> multi-block grid with a masked partial last block
    #    (no wrapper-side padding), and HW < 128 (full-dim lane block).
    k1, k2 = jax.random.split(jax.random.PRNGKey(0))
    xr = jax.random.normal(k1, (2, 50, 8, 8), dtype=jnp.float32)
    out_r = gem_pallas(xr, p_param, eps=eps, static_p=3)
    jax.block_until_ready(out_r)
    ref_r = gem_ref(xr, p_param, eps=eps)
    assert out_r.shape == (2, 50, 1, 1)
    assert jnp.allclose(out_r.astype(jnp.float32), ref_r, rtol=1e-4, atol=1e-5), (
        f"ragged mismatch: max abs err {jnp.max(jnp.abs(out_r.astype(jnp.float32) - ref_r))}")

    # 5) Native bf16 streaming (no wrapper upcast; kernel upcasts inside VMEM).
    xb = jax.random.normal(k2, (2, 8, 16, 16), dtype=jnp.float32).astype(jnp.bfloat16)
    out_b = gem_pallas(xb, p_param, eps=eps, static_p=3)
    jax.block_until_ready(out_b)
    ref_b = gem_ref(xb, p_param, eps=eps)
    assert out_b.dtype == jnp.bfloat16 and out_b.shape == (2, 8, 1, 1)
    assert jnp.allclose(out_b.astype(jnp.float32), ref_b, rtol=1e-2, atol=1e-2), (
        f"bf16 mismatch: max abs err {jnp.max(jnp.abs(out_b.astype(jnp.float32) - ref_b))}")

    print("KERNEL_OK")
</pallas_src>

<mosaic_0001>
module attributes {stable_mosaic.version = 11 : i64} {
  func.func @_gem_kernel_staticp(%arg0: i32, %arg1: memref<8x256xf32, #tpu.memory_space<vmem>>, %arg2: memref<8x1xf32, #tpu.memory_space<vmem>>) attributes {dimension_semantics = [#tpu.dimension_semantics<parallel>], iteration_bounds = array<i64: 1>, scalar_prefetch = 0 : i64, scratch_operands = 0 : i64, tpu.core_type = #tpu.core_type<tc>, window_params = [{transform_indices = @transform_0, window_bounds = array<i64: 8, 256>}, {transform_indices = @transform_1, window_bounds = array<i64: 8, 1>}]} {
    %c0 = arith.constant 0 : index
    %c0_0 = arith.constant 0 : index
    %0 = vector.load %arg1[%c0, %c0_0] : memref<8x256xf32, #tpu.memory_space<vmem>>, vector<8x256xf32>
    %cst = arith.constant 9.99999997E-7 : f32
    %1 = vector.broadcast %cst : f32 to vector<8x256xf32>
    %2 = arith.maximumf %0, %1 : vector<8x256xf32>
    %3 = arith.mulf %2, %2 : vector<8x256xf32>
    %4 = arith.mulf %2, %3 : vector<8x256xf32>
    %cst_1 = arith.constant dense<0.000000e+00> : vector<8xf32>
    %5 = vector.multi_reduction <add>, %4, %cst_1 [1] : vector<8x256xf32> to vector<8xf32>
    %6 = vector.shape_cast %5 : vector<8xf32> to vector<8x1xf32>
    %cst_2 = arith.constant 2.560000e+02 : f32
    %7 = vector.broadcast %cst_2 : f32 to vector<8x1xf32>
    %8 = arith.divf %6, %7 : vector<8x1xf32>
    %cst_3 = arith.constant 1.17549435E-38 : f32
    %9 = vector.broadcast %cst_3 : f32 to vector<8x1xf32>
    %10 = arith.maximumf %8, %9 : vector<8x1xf32>
    %11 = math.log %10 : vector<8x1xf32>
    %cst_4 = arith.constant 0.333333343 : f32
    %12 = vector.broadcast %cst_4 : f32 to vector<8x1xf32>
    %13 = arith.mulf %11, %12 : vector<8x1xf32>
    %14 = math.exp %13 : vector<8x1xf32>
    %c0_5 = arith.constant 0 : index
    %c0_6 = arith.constant 0 : index
    %15 = vector.load %arg2[%c0_5, %c0_6] : memref<8x1xf32, #tpu.memory_space<vmem>>, vector<8x1xf32>
    tpu.vector_store %arg2[%c0_5, %c0_6], %14 {strides = array<i32>} : memref<8x1xf32, #tpu.memory_space<vmem>>, vector<8x1xf32>,
    return
  }
  func.func @transform_0(%arg0: i32) -> (i32, i32) {
    %c0_i32 = arith.constant 0 : i32
    %c0_i32_0 = arith.constant 0 : i32
    return %arg0, %c0_i32 : i32, i32
  }
  func.func @transform_1(%arg0: i32) -> (i32, i32) {
    %c0_i32 = arith.constant 0 : i32
    %c0_i32_0 = arith.constant 0 : i32
    return %arg0, %c0_i32 : i32, i32
  }
}

</mosaic_0001>

<bundles_post_ra>
// kernel: tpu_custom_call.1
= control target key start
LH: loop header
LB: loop body
LE: loop exit
PB: predicated region body
PF: predicated region fallthrough
CT: control target
= control target key end

     0   :  { %6 = vsyncpa [#allocation3], 0  ;;  %s88_s9 = smov [#allocation2]   ;;  %s106_s0 = inlined_call_operand.hbm [shape: f32[8,256], index: 0, kind: input, shape index: {}]   ;;  %s107_s1 = inlined_call_operand.vmem [shape: f32[8,1], index: 1, kind: output, shape index: {}]  }
   0x1   :  { %s12_s8 = sshll.u32 %s106_s0, 4  ;;  %s14_s10 = sshll.u32 %s88_s9, 4  ;;  %s13_s8 = int_to_ptr.hbm [resolvable:$true] %s12_s8  ;;  %s15_s10 = int_to_ptr.vmem [resolvable:$true] %s14_s10 }
   0x2   :  { %17 = dma.hbm_to_vmem [thread:$0]  %s13_s8, 256, %s15_s10, [#allocation3]  }
   0x3   :  { %86 = dma.done.wait [#allocation3], 256  }
   0x4   :  { %87 = vsyncadd [#allocation3], 4294967040  ;;  %v22_v0 = vld [vmem:[#allocation2] sm:$0xff]  ;;  %v23_v1 = vld [vmem:[#allocation2 + $0x8] sm:$0xff]  ;;  %v89_v9 = vmov 256.0   ;;  %vm47_vm1 = vcmask 7168  }
   0x5   :  { %v24_v2 = vmax.f32 %v22_v0, 1e-06  ;;  %v25_v3 = vmax.f32 %v23_v1, 1e-06  ;;  %56 = vrcp.f32 %v89_v9 }
   0x7   :  { %v26_v4 = vmul.f32 %v24_v2, %v24_v2  ;;  %v27_v5 = vmul.f32 %v25_v3, %v25_v3 }
   0x9   :  { %v28_v6 = vmul.f32 %v26_v4, %v24_v2  ;;  %v29_v7 = vmul.f32 %v27_v5, %v25_v3 }
   0xb   :  { %v30_v8 = vadd.f32 %v29_v7, %v28_v6  ;;  %v57_v10 = vpop.eup %56 }
   0xc   :  { %v34_v11 = vmul.f32 256.0, %v57_v10  ;;  %vm38_vm0 = vweird.f32 %v57_v10 }
   0xd   :  { %31 = vadd.xlane.f32.xlu0 %v30_v8 }
   0xe   :  { %v35_v12 = vsub.f32 1.0, %v34_v11 }
  0x10   :  { %v36_v13 = vmul.f32 %v57_v10, %v35_v12 }
  0x12   :  { %v37_v14 = vadd.f32 %v57_v10, %v36_v13 }
  0x14   :  { %v39_v15 = vsel %vm38_vm0, %v57_v10, %v37_v14 }
  0x80   :  { %v32_v16 = vpop.xlane.xlu0 %31 }
  0x81   :  { %v40_v17 = vmul.f32 %v39_v15, %v32_v16 }
  0x83   :  { %v41_v18 = vmax.f32 %v40_v17, 1.1754944e-38 }
  0x85   :  { %58 = vlog2.f32 %v41_v18 }
  0x8b   :  { %v59_v19 = vpop.eup %58 }
  0x8c   :  { %v43_v20 = vmul.f32 0.6931472, %v59_v19 }
  0x8e   :  { %v44_v21 = vmul.f32 0.33333334, %v43_v20 }
  0x90   :  { %v45_v22 = vmul.f32 1.442695, %v44_v21 }
  0x92   :  { %60 = vpow2.f32 %v45_v22 }
  0x98   :  { %v61_v23 = vpop.eup %60 }
  0x99   :  { %48 = vst.msk [vmem:[%s107_s1] sm:$0xff] %vm47_vm1, %v61_v23 }
  0x9a   :  { %53 = vsyncpa [#allocation3], 1 }

</bundles_post_ra>
